<compile_context>
chip_gen: v7x
topology: tpu7x:2x2x1
jax: 0.10.0
libtpu: 0.0.40
codegen_flags: <defaults>
</compile_context>

<pallas_src>
import functools

import numpy as np
import jax
import jax.numpy as jnp
from jax import lax
from jax.experimental import pallas as pl
from jax.experimental.pallas import tpu as pltpu

# Static irreps config: list of (mul, l, parity). Example "8x0e + 4x1o".
IRREPS = ((8, 0, 1), (4, 1, -1))
EPS = 1e-5
NORMALIZATION = "component"   # module default
REDUCE = "mean"               # module default

# Safely below v7x's 64 MiB physical VMEM; plenty of headroom on v5e/v6e.
VMEM_LIMIT_BYTES = 48 * 1024 * 1024


def irreps_dims(irreps):
    dim = sum(mul * (2 * l + 1) for mul, l, p in irreps)
    num_scalar = sum(mul for mul, l, p in irreps if l == 0 and p == 1)
    num_feat = sum(mul for mul, l, p in irreps)
    return dim, num_scalar, num_feat


def _build_constants(irreps, normalization):
    """Block-diagonal constants that fuse the per-irrep loop into full matmuls."""
    dim, ns, nf = irreps_dims(irreps)
    R = np.zeros((dim, nf), np.float32)   # (sum x^2 per dim) @ R -> per-feature norm
    E = np.zeros((nf, dim), np.float32)   # per-feature scale @ E -> per-dim scale
    S = np.zeros((ns, dim), np.float32)   # scalar channel -> its position in DIM
    P = np.zeros((ns, nf), np.float32)    # scalar channel -> its feature column
    ix = ifeat = isc = 0
    for mul, l, p in irreps:
        d = 2 * l + 1
        scale = (1.0 / d) if normalization == "component" else 1.0
        for m in range(mul):
            for c in range(d):
                R[ix + m * d + c, ifeat + m] = scale
                E[ifeat + m, ix + m * d + c] = 1.0
        if l == 0 and p == 1:
            for m in range(mul):
                S[isc + m, ix + m] = 1.0          # d == 1 for scalars
                P[isc + m, ifeat + m] = 1.0
            isc += mul
        ifeat += mul
        ix += mul * d
    return R, E, S, P, dim, ns, nf


def _round_up(x, m):
    return ((x + m - 1) // m) * m


# ---------------------------------------------------------------------------
# Pass 1: per-graph statistics -> per-graph [scale | offset] table
# ---------------------------------------------------------------------------
def _stats_kernel(eps, n_valid,
                  batch_ref, x_ref, r_ref, sselt_ref, p_ref, s_ref, e_ref,
                  ms_ref, w_ref, bias_ref,
                  table_ref, acc_ref):
    f32 = jnp.float32
    i = pl.program_id(0)
    G = acc_ref.shape[0]
    tile_n, DIM = x_ref.shape

    @pl.when(i == 0)
    def _init():
        acc_ref[...] = jnp.zeros_like(acc_ref)

    # One-hot graph membership. Padded batch entries carry sentinel value G
    # -> all-zero one-hot column (so counts / sums are unaffected).
    bt = batch_ref[...]                                                   # (1, tile_n)
    onehot = (bt == lax.broadcasted_iota(jnp.int32, (G, tile_n), 0)).astype(f32)

    # Mask ragged tail rows of the last (partial) tile with jnp.where: the
    # out-of-bounds region of a partial block is undefined (may hold NaN) and
    # 0 * NaN = NaN, so multiply-by-zero via the one-hot is not enough.
    row = i * tile_n + lax.broadcasted_iota(jnp.int32, (tile_n, 1), 0)
    x = jnp.where(row < n_valid, x_ref[...].astype(f32), 0.0)             # (tile_n, DIM)

    # Single fused MXU contraction per tile: accumulates [sum_x | sum_x^2 | count].
    moments = jnp.concatenate(
        [x, x * x, jnp.ones((tile_n, 1), f32)], axis=1)                   # (tile_n, 2*DIM+1)
    acc_ref[...] += jnp.dot(onehot, moments, preferred_element_type=f32)  # (G, 2*DIM+1)

    @pl.when(i == pl.num_programs(0) - 1)
    def _finalize():
        acc = acc_ref[...]
        sum_x = acc[:, :DIM]
        sum_sq = acc[:, DIM:2 * DIM]
        cnt = acc[:, 2 * DIM:2 * DIM + 1]
        inv_cnt = 1.0 / jnp.maximum(cnt, 1.0)                             # exact divide
        mean_full = sum_x * inv_cnt                                       # (G, DIM)
        mean_s = jnp.dot(mean_full, sselt_ref[...],
                         preferred_element_type=f32)                      # (G, NS)
        ms = ms_ref[...]                                                  # (1, NS)
        shift = mean_s * ms                                               # (G, NS)
        # mean((x - s*m)^2) = mean(x^2) - m^2 * s * (2 - s)   (exact identity)
        corr_s = mean_s * mean_s * ms * (2.0 - ms)                        # (G, NS)
        corr = jnp.dot(corr_s, p_ref[...], preferred_element_type=f32)    # (G, NF)
        sq_feat = jnp.dot(sum_sq, r_ref[...], preferred_element_type=f32) # (G, NF)
        field_norm = sq_feat * inv_cnt - corr                             # (G, NF)
        inv = lax.rsqrt(field_norm + eps) * w_ref[...]                    # (G, NF)
        scale_tbl = jnp.dot(inv, e_ref[...], preferred_element_type=f32)      # (G, DIM)
        shift_full = jnp.dot(shift, s_ref[...], preferred_element_type=f32)   # (G, DIM)
        offset_tbl = bias_ref[...] - shift_full * scale_tbl                    # (G, DIM)
        table_ref[...] = jnp.concatenate([scale_tbl, offset_tbl], axis=1)      # (G, 2*DIM)


# ---------------------------------------------------------------------------
# Pass 2: out = x * scale[batch] + offset[batch]   (one gather + FMA per tile)
# ---------------------------------------------------------------------------
def _apply_kernel(batch_ref, x_ref, table_ref, o_ref):
    f32 = jnp.float32
    G = table_ref.shape[0]
    tile_n, DIM = x_ref.shape

    bt = batch_ref[...]                                                   # (1, tile_n)
    onehot = (bt == lax.broadcasted_iota(jnp.int32, (G, tile_n), 0)).astype(f32)

    # Gather per-node [scale | offset] rows with one contraction over G.
    dnum = (((0,), (0,)), ((), ()))
    gathered = lax.dot_general(onehot, table_ref[...], dnum,
                               preferred_element_type=f32)                # (tile_n, 2*DIM)

    x = x_ref[...].astype(f32)
    out = x * gathered[:, :DIM] + gathered[:, DIM:]
    # Partial final blocks: Pallas writes back only the in-bounds rows, so the
    # (garbage) tail rows never reach HBM.
    o_ref[...] = out.astype(o_ref.dtype)                                  # lane-dense store


# ---------------------------------------------------------------------------
# Wrapper
# ---------------------------------------------------------------------------
def equivariant_graph_norm(x, batch, mean_shift, weight, bias, *, num_graphs,
                           irreps=IRREPS, eps=EPS, normalization=NORMALIZATION,
                           affine=True, tile_n=None,
                           vmem_limit_bytes=VMEM_LIMIT_BYTES):
    N, DIM = x.shape
    R, E, S, P, dim, NS, NF = _build_constants(irreps, normalization)
    assert dim == DIM, (dim, DIM)
    G = int(num_graphs)

    # affine=False semantics == weight of ones / bias of zeros.
    if not affine:
        weight = jnp.ones((NF,), jnp.float32)
        bias = jnp.zeros((NS,), jnp.float32)

    # Node tiling.  batch rides the lane axis -> tile_n must be a multiple of 128.
    # VMEM math: a (tile_n, DIM) f32 block is lane-padded to 128 lanes in VMEM,
    # i.e. tile_n * 512 B per buffer (double-buffered by the pipeline).
    # tile_n = 4096 -> ~2 MiB per buffer; both passes (I/O buffers + kernel
    # temporaries) stay around ~20 MiB, safely under the 48 MiB limit below on
    # all of v5e/v6e/v7x.  On v6e (128 MiB VMEM) tile_n of 8192-16384 with a
    # larger vmem_limit_bytes is a further win for very large N.
    if tile_n is None:
        tile_n = min(4096, _round_up(max(N, 1), 128))
    tile_n = max(128, _round_up(tile_n, 128))
    num_tiles = pl.cdiv(N, tile_n)
    n_pad = num_tiles * tile_n

    # Only the tiny (1, n_pad) batch row is padded (sentinel G -> zero one-hot).
    # x is consumed unpadded (ragged tail masked in-kernel) and the output is
    # produced at its natural (N, DIM) shape: no x pad copy, no out[:N] slice.
    bt = jnp.full((1, n_pad), G, jnp.int32).at[0, :N].set(batch.astype(jnp.int32))

    Rj, Ej, Sj, Pj = map(jnp.asarray, (R, E, S, P))
    SselT = Sj.T                                                     # (DIM, NS)
    ms = mean_shift.reshape(1, NS).astype(jnp.float32)
    w = weight.reshape(1, NF).astype(jnp.float32)
    bias_row = jnp.dot(bias.reshape(1, NS).astype(jnp.float32), Sj)  # (1, DIM)

    def full(shape):
        return pl.BlockSpec(shape, lambda i: (0, 0))

    # ---- pass 1: per-graph [scale | offset] table ----
    table = pl.pallas_call(
        functools.partial(_stats_kernel, eps, N),
        out_shape=jax.ShapeDtypeStruct((G, 2 * DIM), jnp.float32),
        grid_spec=pltpu.PrefetchScalarGridSpec(
            num_scalar_prefetch=0,
            grid=(num_tiles,),
            in_specs=[pl.BlockSpec((1, tile_n), lambda i: (0, i)),     # batch
                      pl.BlockSpec((tile_n, DIM), lambda i: (i, 0)),   # x
                      full((DIM, NF)),                                  # R
                      full((DIM, NS)),                                  # S^T
                      full((NS, NF)),                                   # P
                      full((NS, DIM)),                                  # S
                      full((NF, DIM)),                                  # E
                      full((1, NS)),                                    # mean_shift
                      full((1, NF)),                                    # weight
                      full((1, DIM))],                                  # bias row
            out_specs=full((G, 2 * DIM)),
            scratch_shapes=[pltpu.VMEM((G, 2 * DIM + 1), jnp.float32)]),
        compiler_params=pltpu.CompilerParams(
            dimension_semantics=("arbitrary",),
            vmem_limit_bytes=vmem_limit_bytes),
    )(bt, x, Rj, SselT, Pj, Sj, Ej, ms, w, bias_row)

    # ---- pass 2: apply ----
    out = pl.pallas_call(
        _apply_kernel,
        out_shape=jax.ShapeDtypeStruct((N, DIM), x.dtype),
        grid_spec=pltpu.PrefetchScalarGridSpec(
            num_scalar_prefetch=0,
            grid=(num_tiles,),
            in_specs=[pl.BlockSpec((1, tile_n), lambda i: (0, i)),     # batch
                      pl.BlockSpec((tile_n, DIM), lambda i: (i, 0)),   # x
                      full((G, 2 * DIM))],                              # table
            out_specs=pl.BlockSpec((tile_n, DIM), lambda i: (i, 0))),
        compiler_params=pltpu.CompilerParams(
            dimension_semantics=("parallel",),
            vmem_limit_bytes=vmem_limit_bytes),
    )(bt, x, table)

    return out


# ---------------------------------------------------------------------------
# Pure-JAX reference (port of the PyTorch forward) for correctness checking
# ---------------------------------------------------------------------------
def reference(x, batch, mean_shift, weight, bias, num_graphs,
              irreps=IRREPS, eps=EPS):
    N = x.shape[0]
    counts = jax.ops.segment_sum(jnp.ones((N,)), batch, num_segments=num_graphs)
    counts = jnp.maximum(counts, 1.0)
    fields = []
    ix = iw = ib = ims = 0
    for mul, l, p in irreps:
        d = 2 * l + 1
        field = x[:, ix:ix + mul * d].reshape(N, mul, d)
        ix += mul * d
        if l == 0 and p == 1:
            fm = jax.ops.segment_sum(field, batch, num_segments=num_graphs)
            fm = fm / counts[:, None, None]
            ms = mean_shift[ims:ims + mul].reshape(1, mul, 1)
            ims += mul
            field = field - fm[batch] * ms
        fn = (field ** 2).mean(-1)                              # component
        fn = jax.ops.segment_sum(fn, batch, num_segments=num_graphs) / counts[:, None]
        fn = (fn + eps) ** -0.5
        fn = fn * weight[None, iw:iw + mul]
        iw += mul
        field = field * fn[batch][:, :, None]
        if d == 1 and p == 1:
            field = field + bias[ib:ib + mul].reshape(mul, 1)
            ib += mul
        fields.append(field.reshape(N, mul * d))
    return jnp.concatenate(fields, axis=-1)


if __name__ == "__main__":
    DIM, NS, NF = irreps_dims(IRREPS)   # DIM=20, num_scalar=8, num_features=12

    key = jax.random.PRNGKey(0)
    k1, k2, k3, k4, k5, k6 = jax.random.split(key, 6)

    # Parameters (module init: ones / ones / zeros) deterministically perturbed
    # so the affine / mean-shift math is actually exercised.
    mean_shift = jnp.ones((NS,), jnp.float32) + 0.1 * jax.random.normal(k2, (NS,))
    weight = jnp.ones((NF,), jnp.float32) + 0.1 * jax.random.normal(k3, (NF,))
    bias = jnp.zeros((NS,), jnp.float32) + 0.1 * jax.random.normal(k4, (NS,))

    # Test 1: tiny graph batch (single partial tile -> exercises tail masking).
    N1, G1 = 8, 2
    x1 = jax.random.normal(k1, (N1, DIM), jnp.float32)
    b1 = jnp.array([0, 0, 0, 0, 1, 1, 1, 1], dtype=jnp.int32)
    out1 = equivariant_graph_norm(x1, b1, mean_shift, weight, bias, num_graphs=G1)
    out1 = jax.block_until_ready(out1)
    ref1 = reference(x1, b1, mean_shift, weight, bias, G1)
    assert out1.shape == (N1, DIM)
    assert jnp.allclose(out1, ref1, atol=2e-5, rtol=2e-4)

    # Test 2: multi-tile path with ragged last tile (forces tile_n=128, 3 tiles).
    N2, G2 = 300, 3
    x2 = jax.random.normal(k5, (N2, DIM), jnp.float32)
    b2 = jax.random.randint(k6, (N2,), 0, G2).astype(jnp.int32)
    out2 = equivariant_graph_norm(x2, b2, mean_shift, weight, bias,
                                  num_graphs=G2, tile_n=128)
    out2 = jax.block_until_ready(out2)
    ref2 = reference(x2, b2, mean_shift, weight, bias, G2)
    assert out2.shape == (N2, DIM)
    assert jnp.allclose(out2, ref2, atol=2e-5, rtol=2e-4)

    print("KERNEL_OK")
</pallas_src>

<mosaic_0001>
module attributes {stable_mosaic.version = 11 : i64} {
  func.func @_stats_kernel(%arg0: i32, %arg1: memref<1x128xi32, #tpu.memory_space<vmem>>, %arg2: memref<128x20xf32, #tpu.memory_space<vmem>>, %arg3: memref<20x12xf32, #tpu.memory_space<vmem>>, %arg4: memref<20x8xf32, #tpu.memory_space<vmem>>, %arg5: memref<8x12xf32, #tpu.memory_space<vmem>>, %arg6: memref<8x20xf32, #tpu.memory_space<vmem>>, %arg7: memref<12x20xf32, #tpu.memory_space<vmem>>, %arg8: memref<1x8xf32, #tpu.memory_space<vmem>>, %arg9: memref<1x12xf32, #tpu.memory_space<vmem>>, %arg10: memref<1x20xf32, #tpu.memory_space<vmem>>, %arg11: memref<2x40xf32, #tpu.memory_space<vmem>>, %arg12: memref<2x41xf32, #tpu.memory_space<vmem>>) attributes {dimension_semantics = [#tpu.dimension_semantics<arbitrary>], iteration_bounds = array<i64: 1>, scalar_prefetch = 0 : i64, scratch_operands = 1 : i64, tpu.core_type = #tpu.core_type<tc>, window_params = [{transform_indices = @transform_0, window_bounds = array<i64: 1, 128>}, {transform_indices = @transform_1, window_bounds = array<i64: 128, 20>}, {pipeline_mode = #tpu.pipeline_mode<synchronous>, transform_indices = @transform_2, window_bounds = array<i64: 20, 12>}, {pipeline_mode = #tpu.pipeline_mode<synchronous>, transform_indices = @transform_3, window_bounds = array<i64: 20, 8>}, {pipeline_mode = #tpu.pipeline_mode<synchronous>, transform_indices = @transform_4, window_bounds = array<i64: 8, 12>}, {pipeline_mode = #tpu.pipeline_mode<synchronous>, transform_indices = @transform_5, window_bounds = array<i64: 8, 20>}, {pipeline_mode = #tpu.pipeline_mode<synchronous>, transform_indices = @transform_6, window_bounds = array<i64: 12, 20>}, {pipeline_mode = #tpu.pipeline_mode<synchronous>, transform_indices = @transform_7, window_bounds = array<i64: 1, 8>}, {pipeline_mode = #tpu.pipeline_mode<synchronous>, transform_indices = @transform_8, window_bounds = array<i64: 1, 12>}, {pipeline_mode = #tpu.pipeline_mode<synchronous>, transform_indices = @transform_9, window_bounds = array<i64: 1, 20>}, {pipeline_mode = #tpu.pipeline_mode<synchronous>, transform_indices = @transform_10, window_bounds = array<i64: 2, 40>}]} {
    %c0_i32 = arith.constant 0 : i32
    %0 = arith.cmpi eq, %arg0, %c0_i32 : i32
    %1 = arith.extui %0 : i1 to i32
    %c0_i32_0 = arith.constant 0 : i32
    %2 = arith.cmpi ne, %1, %c0_i32_0 : i32
    scf.if %2 {
      %cst_12 = arith.constant 0.000000e+00 : f32
      %30 = vector.broadcast %cst_12 : f32 to vector<2x41xf32>
      %c0_13 = arith.constant 0 : index
      %c0_14 = arith.constant 0 : index
      %31 = vector.load %arg12[%c0_13, %c0_14] : memref<2x41xf32, #tpu.memory_space<vmem>>, vector<2x41xf32>
      tpu.vector_store %arg12[%c0_13, %c0_14], %30 {strides = array<i32>} : memref<2x41xf32, #tpu.memory_space<vmem>>, vector<2x41xf32>,
    } else {
    }
    %c0 = arith.constant 0 : index
    %c0_1 = arith.constant 0 : index
    %3 = vector.load %arg1[%c0, %c0_1] : memref<1x128xi32, #tpu.memory_space<vmem>>, vector<1x128xi32>
    %4 = tpu.iota {dimensions = array<i32: 0>} : vector<2x128xi32>
    %5 = vector.broadcast %3 : vector<1x128xi32> to vector<2x128xi32>
    %6 = arith.cmpi eq, %5, %4 : vector<2x128xi32>
    %7 = arith.extui %6 : vector<2x128xi1> to vector<2x128xi32>
    %8 = arith.sitofp %7 : vector<2x128xi32> to vector<2x128xf32>
    %c128_i32 = arith.constant 128 : i32
    %9 = arith.muli %arg0, %c128_i32 : i32
    %10 = tpu.iota {dimensions = array<i32: 0>} : vector<128x1xi32>
    %11 = vector.broadcast %9 : i32 to vector<128x1xi32>
    %12 = arith.addi %11, %10 : vector<128x1xi32>
    %c8_i32 = arith.constant 8 : i32
    %13 = vector.broadcast %c8_i32 : i32 to vector<128x1xi32>
    %14 = arith.cmpi slt, %12, %13 : vector<128x1xi32>
    %c0_2 = arith.constant 0 : index
    %c0_3 = arith.constant 0 : index
    %15 = vector.load %arg2[%c0_2, %c0_3] : memref<128x20xf32, #tpu.memory_space<vmem>>, vector<128x20xf32>
    %cst = arith.constant 0.000000e+00 : f32
    %16 = vector.shape_cast %14 : vector<128x1xi1> to vector<128x1xi1>
    %17 = vector.broadcast %16 : vector<128x1xi1> to vector<128x20xi1>
    %18 = vector.broadcast %cst : f32 to vector<128x20xf32>
    %19 = arith.select %17, %15, %18 : vector<128x20xi1>, vector<128x20xf32>
    %20 = arith.mulf %19, %19 : vector<128x20xf32>
    %cst_4 = arith.constant 1.000000e+00 : f32
    %21 = vector.broadcast %cst_4 : f32 to vector<128x1xf32>
    %22 = tpu.concatenate %19, %20, %21 in 1 : vector<128x20xf32>, vector<128x20xf32>, vector<128x1xf32> -> vector<128x41xf32>
    %c0_5 = arith.constant 0 : index
    %c0_6 = arith.constant 0 : index
    %23 = vector.load %arg12[%c0_5, %c0_6] : memref<2x41xf32, #tpu.memory_space<vmem>>, vector<2x41xf32>
    %cst_7 = arith.constant dense<0.000000e+00> : vector<2x41xf32>
    %24 = tpu.matmul %8, %22, %cst_7 {dimension_numbers = #tpu.dot_dimension_numbers<[1], [0], [0], [1], [0, 0, 1, 1], [], []>} : vector<2x128xf32>, vector<128x41xf32>, vector<2x41xf32> -> vector<2x41xf32>
    %25 = arith.addf %23, %24 : vector<2x41xf32>
    %c0_8 = arith.constant 0 : index
    %c0_9 = arith.constant 0 : index
    %26 = vector.load %arg12[%c0_8, %c0_9] : memref<2x41xf32, #tpu.memory_space<vmem>>, vector<2x41xf32>
    tpu.vector_store %arg12[%c0_8, %c0_9], %25 {strides = array<i32>} : memref<2x41xf32, #tpu.memory_space<vmem>>, vector<2x41xf32>,
    %c0_i32_10 = arith.constant 0 : i32
    %27 = arith.cmpi eq, %arg0, %c0_i32_10 : i32
    %28 = arith.extui %27 : i1 to i32
    %c0_i32_11 = arith.constant 0 : i32
    %29 = arith.cmpi ne, %28, %c0_i32_11 : i32
    scf.if %29 {
      %c0_12 = arith.constant 0 : index
      %c0_13 = arith.constant 0 : index
      %30 = vector.load %arg12[%c0_12, %c0_13] : memref<2x41xf32, #tpu.memory_space<vmem>>, vector<2x41xf32>
      %31 = vector.extract_strided_slice %30 {offsets = [0, 0], sizes = [2, 20], strides = [1, 1]} : vector<2x41xf32> to vector<2x20xf32>
      %32 = vector.extract_strided_slice %30 {offsets = [0, 20], sizes = [2, 20], strides = [1, 1]} : vector<2x41xf32> to vector<2x20xf32>
      %33 = vector.extract_strided_slice %30 {offsets = [0, 40], sizes = [2, 1], strides = [1, 1]} : vector<2x41xf32> to vector<2x1xf32>
      %cst_14 = arith.constant 1.000000e+00 : f32
      %34 = vector.broadcast %cst_14 : f32 to vector<2x1xf32>
      %35 = arith.maximumf %33, %34 : vector<2x1xf32>
      %cst_15 = arith.constant 1.000000e+00 : f32
      %36 = vector.broadcast %cst_15 : f32 to vector<2x1xf32>
      %37 = arith.divf %36, %35 : vector<2x1xf32>
      %38 = vector.broadcast %37 : vector<2x1xf32> to vector<2x20xf32>
      %39 = arith.mulf %31, %38 : vector<2x20xf32>
      %c0_16 = arith.constant 0 : index
      %c0_17 = arith.constant 0 : index
      %40 = vector.load %arg4[%c0_16, %c0_17] : memref<20x8xf32, #tpu.memory_space<vmem>>, vector<20x8xf32>
      %cst_18 = arith.constant dense<0.000000e+00> : vector<2x8xf32>
      %41 = tpu.matmul %39, %40, %cst_18 {dimension_numbers = #tpu.dot_dimension_numbers<[1], [0], [0], [1], [0, 0, 1, 1], [], []>} : vector<2x20xf32>, vector<20x8xf32>, vector<2x8xf32> -> vector<2x8xf32>
      %c0_19 = arith.constant 0 : index
      %c0_20 = arith.constant 0 : index
      %42 = vector.load %arg8[%c0_19, %c0_20] : memref<1x8xf32, #tpu.memory_space<vmem>>, vector<1x8xf32>
      %43 = vector.broadcast %42 : vector<1x8xf32> to vector<2x8xf32>
      %44 = arith.mulf %41, %43 : vector<2x8xf32>
      %45 = arith.mulf %41, %41 : vector<2x8xf32>
      %46 = vector.broadcast %42 : vector<1x8xf32> to vector<2x8xf32>
      %47 = arith.mulf %45, %46 : vector<2x8xf32>
      %cst_21 = arith.constant 2.000000e+00 : f32
      %48 = vector.broadcast %cst_21 : f32 to vector<1x8xf32>
      %49 = arith.subf %48, %42 : vector<1x8xf32>
      %50 = vector.broadcast %49 : vector<1x8xf32> to vector<2x8xf32>
      %51 = arith.mulf %47, %50 : vector<2x8xf32>
      %c0_22 = arith.constant 0 : index
      %c0_23 = arith.constant 0 : index
      %52 = vector.load %arg5[%c0_22, %c0_23] : memref<8x12xf32, #tpu.memory_space<vmem>>, vector<8x12xf32>
      %cst_24 = arith.constant dense<0.000000e+00> : vector<2x12xf32>
      %53 = tpu.matmul %51, %52, %cst_24 {dimension_numbers = #tpu.dot_dimension_numbers<[1], [0], [0], [1], [0, 0, 1, 1], [], []>} : vector<2x8xf32>, vector<8x12xf32>, vector<2x12xf32> -> vector<2x12xf32>
      %c0_25 = arith.constant 0 : index
      %c0_26 = arith.constant 0 : index
      %54 = vector.load %arg3[%c0_25, %c0_26] : memref<20x12xf32, #tpu.memory_space<vmem>>, vector<20x12xf32>
      %cst_27 = arith.constant dense<0.000000e+00> : vector<2x12xf32>
      %55 = tpu.matmul %32, %54, %cst_27 {dimension_numbers = #tpu.dot_dimension_numbers<[1], [0], [0], [1], [0, 0, 1, 1], [], []>} : vector<2x20xf32>, vector<20x12xf32>, vector<2x12xf32> -> vector<2x12xf32>
      %56 = vector.broadcast %37 : vector<2x1xf32> to vector<2x12xf32>
      %57 = arith.mulf %55, %56 : vector<2x12xf32>
      %58 = arith.subf %57, %53 : vector<2x12xf32>
      %cst_28 = arith.constant 9.99999974E-6 : f32
      %59 = vector.broadcast %cst_28 : f32 to vector<2x12xf32>
      %60 = arith.addf %58, %59 : vector<2x12xf32>
      %61 = math.rsqrt %60 : vector<2x12xf32>
      %c0_29 = arith.constant 0 : index
      %c0_30 = arith.constant 0 : index
      %62 = vector.load %arg9[%c0_29, %c0_30] : memref<1x12xf32, #tpu.memory_space<vmem>>, vector<1x12xf32>
      %63 = vector.broadcast %62 : vector<1x12xf32> to vector<2x12xf32>
      %64 = arith.mulf %61, %63 : vector<2x12xf32>
      %c0_31 = arith.constant 0 : index
      %c0_32 = arith.constant 0 : index
      %65 = vector.load %arg7[%c0_31, %c0_32] : memref<12x20xf32, #tpu.memory_space<vmem>>, vector<12x20xf32>
      %cst_33 = arith.constant dense<0.000000e+00> : vector<2x20xf32>
      %66 = tpu.matmul %64, %65, %cst_33 {dimension_numbers = #tpu.dot_dimension_numbers<[1], [0], [0], [1], [0, 0, 1, 1], [], []>} : vector<2x12xf32>, vector<12x20xf32>, vector<2x20xf32> -> vector<2x20xf32>
      %c0_34 = arith.constant 0 : index
      %c0_35 = arith.constant 0 : index
      %67 = vector.load %arg6[%c0_34, %c0_35] : memref<8x20xf32, #tpu.memory_space<vmem>>, vector<8x20xf32>
      %cst_36 = arith.constant dense<0.000000e+00> : vector<2x20xf32>
      %68 = tpu.matmul %44, %67, %cst_36 {dimension_numbers = #tpu.dot_dimension_numbers<[1], [0], [0], [1], [0, 0, 1, 1], [], []>} : vector<2x8xf32>, vector<8x20xf32>, vector<2x20xf32> -> vector<2x20xf32>
      %c0_37 = arith.constant 0 : index
      %c0_38 = arith.constant 0 : index
      %69 = vector.load %arg10[%c0_37, %c0_38] : memref<1x20xf32, #tpu.memory_space<vmem>>, vector<1x20xf32>
      %70 = arith.mulf %68, %66 : vector<2x20xf32>
      %71 = vector.broadcast %69 : vector<1x20xf32> to vector<2x20xf32>
      %72 = arith.subf %71, %70 : vector<2x20xf32>
      %73 = tpu.concatenate %66, %72 in 1 : vector<2x20xf32>, vector<2x20xf32> -> vector<2x40xf32>
      %c0_39 = arith.constant 0 : index
      %c0_40 = arith.constant 0 : index
      %74 = vector.load %arg11[%c0_39, %c0_40] : memref<2x40xf32, #tpu.memory_space<vmem>>, vector<2x40xf32>
      tpu.vector_store %arg11[%c0_39, %c0_40], %73 {strides = array<i32>} : memref<2x40xf32, #tpu.memory_space<vmem>>, vector<2x40xf32>,
    } else {
    }
    return
  }
  func.func @transform_0(%arg0: i32) -> (i32, i32) {
    %c0_i32 = arith.constant 0 : i32
    %c0_i32_0 = arith.constant 0 : i32
    return %c0_i32, %arg0 : i32, i32
  }
  func.func @transform_1(%arg0: i32) -> (i32, i32) {
    %c0_i32 = arith.constant 0 : i32
    %c0_i32_0 = arith.constant 0 : i32
    return %arg0, %c0_i32 : i32, i32
  }
  func.func @transform_2(%arg0: i32) -> (i32, i32) {
    %c0_i32 = arith.constant 0 : i32
    %c0_i32_0 = arith.constant 0 : i32
    %c0_i32_1 = arith.constant 0 : i32
    return %c0_i32, %c0_i32_0 : i32, i32
  }
  func.func @transform_3(%arg0: i32) -> (i32, i32) {
    %c0_i32 = arith.constant 0 : i32
    %c0_i32_0 = arith.constant 0 : i32
    %c0_i32_1 = arith.constant 0 : i32
    return %c0_i32, %c0_i32_0 : i32, i32
  }
  func.func @transform_4(%arg0: i32) -> (i32, i32) {
    %c0_i32 = arith.constant 0 : i32
    %c0_i32_0 = arith.constant 0 : i32
    %c0_i32_1 = arith.constant 0 : i32
    return %c0_i32, %c0_i32_0 : i32, i32
  }
  func.func @transform_5(%arg0: i32) -> (i32, i32) {
    %c0_i32 = arith.constant 0 : i32
    %c0_i32_0 = arith.constant 0 : i32
    %c0_i32_1 = arith.constant 0 : i32
    return %c0_i32, %c0_i32_0 : i32, i32
  }
  func.func @transform_6(%arg0: i32) -> (i32, i32) {
    %c0_i32 = arith.constant 0 : i32
    %c0_i32_0 = arith.constant 0 : i32
    %c0_i32_1 = arith.constant 0 : i32
    return %c0_i32, %c0_i32_0 : i32, i32
  }
  func.func @transform_7(%arg0: i32) -> (i32, i32) {
    %c0_i32 = arith.constant 0 : i32
    %c0_i32_0 = arith.constant 0 : i32
    %c0_i32_1 = arith.constant 0 : i32
    return %c0_i32, %c0_i32_0 : i32, i32
  }
  func.func @transform_8(%arg0: i32) -> (i32, i32) {
    %c0_i32 = arith.constant 0 : i32
    %c0_i32_0 = arith.constant 0 : i32
    %c0_i32_1 = arith.constant 0 : i32
    return %c0_i32, %c0_i32_0 : i32, i32
  }
  func.func @transform_9(%arg0: i32) -> (i32, i32) {
    %c0_i32 = arith.constant 0 : i32
    %c0_i32_0 = arith.constant 0 : i32
    %c0_i32_1 = arith.constant 0 : i32
    return %c0_i32, %c0_i32_0 : i32, i32
  }
  func.func @transform_10(%arg0: i32) -> (i32, i32) {
    %c0_i32 = arith.constant 0 : i32
    %c0_i32_0 = arith.constant 0 : i32
    %c0_i32_1 = arith.constant 0 : i32
    return %c0_i32, %c0_i32_0 : i32, i32
  }
}

</mosaic_0001>

<bundles_post_ra>
// kernel: tpu_custom_call.1
= control target key start
LH: loop header
LB: loop body
LE: loop exit
PB: predicated region body
PF: predicated region fallthrough
CT: control target
= control target key end

     0   :  { %v1042_v2 = vmov 0.0|0.0   ;;  %s1250_s0 = inlined_call_operand.vmem [shape: s32[1,128], index: 0, kind: input, shape index: {}]   ;;  %s1251_s1 = inlined_call_operand.vmem [shape: f32[8,20], index: 1, kind: input, shape index: {}]   ;;  %s1252_s2 = inlined_call_operand.vmem [shape: f32[20,12], index: 2, kind: input, shape index: {}]   ;;  %s1253_s3 = inlined_call_operand.vmem [shape: f32[20,8], index: 3, kind: input, shape index: {}]   ;;  %s1254_s4 = inlined_call_operand.vmem [shape: f32[8,12], index: 4, kind: input, shape index: {}]   ;;  %s1255_s5 = inlined_call_operand.vmem [shape: f32[8,20], index: 5, kind: input, shape index: {}]   ;;  %s1256_s6 = inlined_call_operand.vmem [shape: f32[12,20], index: 6, kind: input, shape index: {}]   ;;  %s1257_s7 = inlined_call_operand.vmem [shape: f32[1,8], index: 7, kind: input, shape index: {}]   ;;  %s1258_s8 = inlined_call_operand.vmem [shape: f32[1,12], index: 8, kind: input, shape index: {}]   ;;  %s1259_s9 = inlined_call_operand.vmem [shape: f32[1,20], index: 9, kind: input, shape index: {}]   ;;  %s1260_s10 = inlined_call_operand.hbm [shape: f32[2,40], index: 10, kind: output, shape index: {}]  }
   0x1   :  { %v101_v0 = vld [vmem:[%s1251_s1] sm:$0xff]  ;;  %930 = vmatprep.subr.bf16.mxu0 %v1042_v2 }
   0x2   :  { %v165_v1 = vmul.f32 %v101_v0, %v101_v0 }
   0x3   :  { %15 = vsyncpa [#allocation4], 0  ;;  %954 = vmatprep.subr.bf16.mxu1 %v1042_v2  ;;  %v1043_v3 = vmov 0.0   ;;  %s1044_s15 = smov 20   ;;  %vm1045_vm0 = vmmov 0   ;;  %vm40_vm1 = vcmask 328704  }
   0x4   :  { %v973_v4 = vpack.i.bf16 %v1043_v3, %v165_v1  ;;  %984 = vrot.lane.b32.xlu1 %v1043_v3, %s1044_s15  ;;  %892 = vmatprep.mubr.msk.f32.mxu0 %vm1045_vm0, %v1043_v3  ;;  %41 = vst.msk [vmem:[#allocation2] sm:$0x3] %vm40_vm1, %v1043_v3  ;;  %vm245_vm2 = vcmask 162816   ;;  %vm262_vm3 = vcmask 326656   ;;  %vm372_vm5 = vcmask 1043456  }
   0x5   :  { %901 = vmatprep.mubr.msk.f32.mxu1 %vm1045_vm0, %v1043_v3  ;;  %vm465_vm6 = vcmask 64512   ;;  %vm1049_vm7 = vmmov 1   ;;  %vm634_vm9 = vcmask 97280   ;;  %vm799_vm10 = vcmask 320512  }
   0x6   :  { %974 = vrot.lane.b32.xlu0 %v973_v4, %s1044_s15  ;;  %v43_v4 = vlaneseq  ;;  %vm962_vm8 = vmpackc.low %vm372_vm5, %vm1049_vm7 }
   0x8   :  { %989 = vrot.lane.b32.xlu1 %v1043_v3, %s1044_s15 }
   0xa   :  { %979 = vrot.lane.b32.xlu0 %v1043_v3, %s1044_s15 }
   0xc   :  { %999 = vrot.lane.b32.xlu1 %v1043_v3, %s1044_s15 }
   0xe   :  { %994 = vrot.lane.b32.xlu0 %v1043_v3, %s1044_s15 }
  0x10   :  { %1009 = vrot.lane.b32.xlu1 %v1043_v3, %s1044_s15 }
  0x12   :  { %1004 = vrot.lane.b32.xlu0 %v1043_v3, %s1044_s15 }
  0x76   :  { %v985_v5 = vpop.permute.xlu1 %984 }
  0x77   :  { %v987_v6 = vunpack.i.h.bf16 %v985_v5  ;;  %v986_v8 = vunpack.i.l.bf16 %v985_v5 }
  0x78   :  { %v975_v7 = vpop.permute.xlu0 %974 }
  0x79   :  { %v977_v9 = vunpack.i.h.bf16 %v975_v7  ;;  %v976_v10 = vunpack.i.l.bf16 %v975_v7  ;;  %v251_v14 = vsel %vm245_vm2, 0.0, %v987_v6  ;;  %v250_v18 = vsel %vm245_vm2, 0.0, %v986_v8 }
  0x7a   :  { %v990_v11 = vpop.permute.xlu1 %989  ;;  %v268_v26 = vsel %vm262_vm3, %v251_v14, 1.0  ;;  %v267_v29 = vsel %vm262_vm3, %v250_v18, 1.0  ;;  %v44_v8 = vshrl.u32 %v43_v4, 7  ;;  %v279_v14 = vld [vmem:[#allocation2] sm:$0x3] }
  0x7b   :  { %v246_v12 = vsel %vm245_vm2, %v101_v0, %v976_v10  ;;  %v247_v13 = vsel %vm245_vm2, 0.0, %v977_v9  ;;  %v992_v19 = vunpack.i.h.bf16 %v990_v11  ;;  %v991_v23 = vunpack.i.l.bf16 %v990_v11  ;;  %v815_v9 = vld [vmem:[%s1250_s0] ss:$0 sm:$0xff]  ;;  %s1048_s0 = smov 108  }
  0x7c   :  { %v980_v15 = vpop.permute.xlu0 %979  ;;  %v263_v16 = vsel %vm262_vm3, %v246_v12, 1.0  ;;  %v264_v17 = vsel %vm262_vm3, %v247_v13, 1.0  ;;  %v937_v37 = vpack.c.bf16 %v268_v26, %v267_v29  ;;  %vm49_vm4 = vcmp.eq.s32.totalorder %v815_v9, %v44_v8  ;;  %v366_v12 = vld [vmem:[%s1253_s3] sm:$0xff]  ;;  %v367_v13 = vld [vmem:[%s1253_s3 + $0x8] sm:$0xff] }
  0x7d   :  { %v982_v20 = vunpack.i.h.bf16 %v980_v15  ;;  %v981_v21 = vunpack.i.l.bf16 %v980_v15  ;;  %v931_v22 = vpack.c.bf16 %v264_v17, %v263_v16  ;;  %v253_v30 = vsel %vm245_vm2, 0.0, %v992_v19 }
  0x7e   :  { %v252_v33 = vsel %vm245_vm2, 0.0, %v991_v23  ;;  %v1000_v36 = vpop.permute.xlu1 %999  ;;  %v270_v38 = vsel %vm262_vm3, %v253_v30, 1.0  ;;  %v1046_v10 = vmov 1.0   ;;  %v1047_v11 = vmov 40  }
  0x7f   :  { %v249_v24 = vsel %vm245_vm2, 0.0, %v982_v20  ;;  %v248_v25 = vsel %vm245_vm2, 0.0, %v981_v21  ;;  %932 = vmatpush3.bf16.msra.mxu0 %v931_v22  ;;  %v269_v39 = vsel %vm262_vm3, %v252_v33, 1.0  ;;  %v1002_v42 = vunpack.i.h.bf16 %v1000_v36  ;;  %1013 = vset.pattern.permute.xlu0 %v1047_v11  ;;  %v368_v22 = vld [vmem:[%s1253_s3 + $0x10] sm:$0xf] }
  0x80   :  { %v266_v27 = vsel %vm262_vm3, %v249_v24, 1.0  ;;  %v265_v28 = vsel %vm262_vm3, %v248_v25, 1.0  ;;  %933 = vmatprep.subr.bf16.mxu0 %v1042_v2  ;;  %v995_v31 = vpop.permute.xlu0 %994  ;;  %v1001_v43 = vunpack.i.l.bf16 %v1000_v36  ;;  %v940_v45 = vpack.c.bf16 %v270_v38, %v269_v39  ;;  %v464_v25 = vld [vmem:[%s1254_s4] sm:$0xff]  ;;  %v540_v36 = vld [vmem:[%s1252_s2 + $0x8] sm:$0xff] }
  0x81   :  { %v934_v32 = vpack.c.bf16 %v266_v27, %v265_v28  ;;  %v997_v34 = vunpack.i.h.bf16 %v995_v31  ;;  %v996_v35 = vunpack.i.l.bf16 %v995_v31  ;;  %v257_v48 = vsel %vm245_vm2, 0.0, %v1002_v42  ;;  %v446_v27 = vld [vmem:[%s1257_s7] sm:$0x1] }
  0x82   :  { %v256_v49 = vsel %vm245_vm2, 0.0, %v1001_v43  ;;  %v1010_v52 = vpop.permute.xlu1 %1009  ;;  %v274_v54 = vsel %vm262_vm3, %v257_v48, 1.0  ;;  %v955_v15 = vpack.c.bf16 %v367_v13, %v366_v12  ;;  %v450_v26 = vsub.s32 0, %v44_v8  ;;  %v632_v42 = vld [vmem:[%s1256_s6] sm:$0xff]  ;;  %v633_v43 = vld [vmem:[%s1256_s6 + $0x8] sm:$0xf] }
  0x83   :  { %935 = vmatpush3.bf16.msra.mxu0 %v934_v32  ;;  %v255_v40 = vsel %vm245_vm2, 0.0, %v997_v34  ;;  %v254_v41 = vsel %vm245_vm2, 0.0, %v996_v35  ;;  %v273_v55 = vsel %vm262_vm3, %v256_v49, 1.0  ;;  %v1012_v58 = vunpack.i.h.bf16 %v1010_v52  ;;  %v539_v35 = vld [vmem:[%s1252_s2] sm:$0xff] }
  0x84   :  { %936 = vmatprep.subr.bf16.mxu0 %v1042_v2  ;;  %v1005_v44 = vpop.permute.xlu0 %1004  ;;  %v272_v46 = vsel %vm262_vm3, %v255_v40, 1.0  ;;  %v271_v47 = vsel %vm262_vm3, %v254_v41, 1.0  ;;  %v1011_v59 = vunpack.i.l.bf16 %v1010_v52  ;;  %v946_v60 = vpack.c.bf16 %v274_v54, %v273_v55  ;;  %956 = vmatpush3.bf16.msra.mxu1 %v955_v15  ;;  %v541_v40 = vld [vmem:[%s1252_s2 + $0x10] sm:$0xf]  ;;  %v711_v54 = vld [vmem:[%s1255_s5] sm:$0xff]  ;;  %s1050_s5 = smov [#allocation3]  }
  0x85   :  { %v1007_v50 = vunpack.i.h.bf16 %v1005_v44  ;;  %v1006_v51 = vunpack.i.l.bf16 %v1005_v44  ;;  %v943_v53 = vpack.c.bf16 %v272_v46, %v271_v47  ;;  %v261_v63 = vsel %vm245_vm2, 0.0, %v1012_v58  ;;  %899 = vmatprep.subr.mxu1 %v1043_v3  ;;  %v827_v58 = vld [vmem:[%s1259_s9] ss:$0 sm:$0xff] }
  0x86   :  { %v260_v0 = vsel %vm245_vm2, 0.0, %v1011_v59  ;;  %v278_v5 = vsel %vm262_vm3, %v261_v63, 1.0  ;;  %v451_v28 = vrot.slane %v446_v27, %v450_v26  ;;  %v456_v29 = vsub.f32 2.0, %v446_v27 }
  0x87   :  { %938 = vmatpush3.bf16.msra.mxu0 %v937_v37  ;;  %v259_v56 = vsel %vm245_vm2, 0.0, %v1007_v50  ;;  %v258_v57 = vsel %vm245_vm2, 0.0, %v1006_v51  ;;  %v277_v6 = vsel %vm262_vm3, %v260_v0, 1.0  ;;  %v958_v38 = vpack.c.bf16 %v540_v36, %v539_v35  ;;  %v823_v51 = vld [vmem:[%s1258_s8] ss:$0 sm:$0xff]  ;;  %s807_s8 = sshll.u32 %s1050_s5, 4  ;;  %s808_s8 = int_to_ptr.vmem [resolvable:$true] %s807_s8 }
  0x88   :  { %939 = vmatprep.subr.bf16.mxu0 %v1042_v2  ;;  %v276_v61 = vsel %vm262_vm3, %v259_v56, 1.0  ;;  %v275_v62 = vsel %vm262_vm3, %v258_v57, 1.0  ;;  %v952_v7 = vpack.c.bf16 %v278_v5, %v277_v6  ;;  %900 = vmatpush3.msk.msra.mxu1 %vm372_vm5, %v368_v22  ;;  %v461_v33 = vrot.slane %v456_v29, %v450_v26  ;;  %s1018_s18 = scalar_lea.vmem %s808_s8, 32  ;;  %p1023_p1 = scmp.lt.s32.totalorder %s808_s8, %s808_s8 }
  0x89   :  { %v949_v1 = vpack.c.bf16 %v276_v61, %v275_v62  ;;  %904 = vmatprep.subr.mxu1 %v1043_v3  ;;  %v961_v44 = vpack.c.bf16 %v633_v43, %v632_v42  ;;  %p1019_p0 = scmp.ne.s32.totalorder %s808_s8, %s1018_s18  ;;  %p1024_p2 = scmp.lt.s32.totalorder %s1018_s18, %s1018_s18 }
  0x8b   :  { %941 = vmatpush3.bf16.msra.mxu0 %v940_v45  ;;  %p1025_p3 = por %p1024_p2, %p1023_p1 }
  0x8c   :  { %942 = vmatprep.subr.bf16.mxu0 %v1042_v2 }
  0x8d   :  { %p1026_p4 = pnand %p1025_p3, %p1019_p0 }
  0x8f   :  { %944 = vmatpush3.bf16.msra.mxu0 %v943_v53 }
  0x90   :  { %945 = vmatprep.subr.bf16.mxu0 %v1042_v2 }
  0x93   :  { %947 = vmatpush3.bf16.msra.mxu0 %v946_v60 }
  0x94   :  { %948 = vmatprep.subr.bf16.mxu0 %v1042_v2 }
  0x97   :  { %950 = vmatpush3.bf16.msra.mxu0 %v949_v1 }
  0x98   :  { %951 = vmatprep.subr.bf16.mxu0 %v1042_v2 }
  0x9b   :  { %953 = vmatpush3.bf16.msra.mxu0 %v952_v7 }
  0x9e   :  { %893 = vmatmul.mubr.msk.f32.vlgmr.msra.gmra.mrb[0].mxu0 %vm49_vm4, %v1046_v10 }
 0x171   :  { %v346_v16 = vpop.f32.mrb[0].mxu0 }
 0x172   :  { %v350_v17 = vadd.f32 %v346_v16, %v279_v14  ;;  %v894_v18 = vpop.f32.mrb[1].mxu0 }
 0x174   :  { %352 = vst.msk [vmem:[#allocation2] sm:$0x3] %vm40_vm1, %v350_v17 }
 0x17b   :  { %v356_v19 = vld [vmem:[#allocation2] sm:$0x3] }
 0x17c   :  { %543 = vrot.lane.b32.xlu1 %v356_v19, %s1048_s0  ;;  %v357_v20 = vmax.f32 %v356_v19, 1.0 }
 0x17e   :  { %1014 = vrcp.f32 %v357_v20 }
 0x188   :  { %v1015_v21 = vpop.eup %1014 }
 0x189   :  { %362 = vperm.xlu0 %1013, %v1015_v21  }
 0x1ee   :  { %v544_v41 = vpop.permute.xlu1 %543 }
 0x208   :  { %v363_v23 = vpop.permute.xlu0 %362 }
 0x209   :  { %v365_v24 = vmul.f32 %v363_v23, %v356_v19 }
 0x20b   :  { %902 = vmatmul.mubr.msk.f32.vlgmr.msra.gmra.mrb[0].mxu1 %vm245_vm2, %v365_v24 }
 0x20c   :  { %906 = vmatprep.mubr.msk.f32.mxu1 %vm1045_vm0, %v1043_v3  ;;  %905 = vmatpush3.msra.mxu1 %v464_v25 }
 0x20d   :  { %957 = vmatprep.subr.bf16.mxu1 %v1042_v2 }
 0x2de   :  { %v442_v30 = vpop.f32.mrb[0].mxu1 }
 0x2df   :  { %v453_v31 = vmul.f32 %v451_v28, %v442_v30  ;;  %v454_v32 = vmul.f32 %v442_v30, %v442_v30  ;;  %v903_v34 = vpop.f32.mrb[1].mxu1 }
 0x2e1   :  { %v455_v37 = vmul.f32 %v454_v32, %v451_v28 }
 0x2e3   :  { %v463_v39 = vmul.f32 %v461_v33, %v455_v37 }
 0x2e5   :  { %907 = vmatmul.mubr.msk.f32.vlgmr.msra.gmra.mrb[2].mxu1 %vm465_vm6, %v463_v39 }
 0x2e6   :  { %959 = vmatpush3.bf16.msra.mxu1 %v958_v38  ;;  %915 = vmatprep.mubr.msk.f32.mxu1 %vm1045_vm0, %v1043_v3 }
 0x2e7   :  { %913 = vmatprep.subr.mxu1 %v1043_v3 }
 0x2ea   :  { %914 = vmatpush3.msk.msra.mxu1 %vm372_vm5, %v541_v40 }
 0x2eb   :  { %916 = vmatmul.mubr.msk.f32.vlgmr.msra.gmra.mrb[4].mxu1 %vm245_vm2, %v544_v41  ;;  %960 = vmatprep.subr.bf16.mxu1 %v1042_v2 }
 0x2ec   :  { %922 = vmatprep.mubr.msk.f32.mxu1 %vm1045_vm0, %v1043_v3  ;;  %963 = vmatpush3.bf16.msk.msra.mxu1 %vm962_vm8, %v961_v44 }
 0x2ed   :  { %925 = vmatprep.subr.mxu1 %v1043_v3 }
 0x3b8   :  { %v535_v45 = vpop.f32.mrb[2].mxu1 }
 0x3b9   :  { %v908_v2 = vpop.f32.mrb[3].mxu1 }
 0x3be   :  { %v616_v46 = vpop.f32.mrb[4].mxu1 }
 0x3bf   :  { %v620_v47 = vmul.f32 %v616_v46, %v363_v23  ;;  %v917_v48 = vpop.f32.mrb[5].mxu1 }
 0x3c1   :  { %v621_v49 = vsub.f32 %v620_v47, %v535_v45 }
 0x3c3   :  { %v622_v50 = vadd.f32 1e-05, %v621_v49 }
 0x3c5   :  { %1016 = vrsqrt.f32 %v622_v50 }
 0x3cf   :  { %v1017_v52 = vpop.eup %1016 }
 0x3d0   :  { %v631_v53 = vmul.f32 %v1017_v52, %v823_v51 }
 0x3d2   :  { %923 = vmatmul.mubr.msk.f32.vlgmr.msra.gmra.mrb[6].mxu1 %vm634_vm9, %v631_v53 }
 0x3d3   :  { %926 = vmatpush3.msra.mxu1 %v711_v54  ;;  %927 = vmatprep.mubr.msk.f32.mxu1 %vm1045_vm0, %v1043_v3 }
 0x3d6   :  { %928 = vmatmul.mubr.msk.f32.vlgmr.msra.gmra.mrb[8].mxu1 %vm465_vm6, %v453_v31 }
 0x4a5   :  { %v707_v55 = vpop.f32.mrb[6].mxu1 }
 0x4a6   :  { %v924_v56 = vpop.f32.mrb[7].mxu1 }
 0x4a9   :  { %v781_v57 = vpop.f32.mrb[8].mxu1 }
 0x4aa   :  { %v786_v59 = vmul.f32 %v781_v57, %v707_v55  ;;  %v929_v60 = vpop.f32.mrb[9].mxu1 }
 0x4ac   :  { %v793_v61 = vsub.f32 %v827_v58, %v786_v59 }
 0x4ae   :  { %795 = vrot.lane.b32.xlu1 %v793_v61, %s1044_s15 }
 0x520   :  { %v796_v62 = vpop.permute.xlu1 %795 }
 0x521   :  { %v798_v3 = vsel %vm245_vm2, %v707_v55, %v796_v62 }
 0x522   :  { %800 = vst.msk [vmem:[#allocation3] sm:$0x3] %vm799_vm10, %v798_v3 }
 0x523   :  { %1029 = shalt.err (!%p1026_p4)
}
 0x524   :  { %s1030_s20 = scalar_lea.hbm %s1260_s10, 32 }
 0x525   :  { %p1031_p5 = scmp.ne.s32.totalorder %s1260_s10, %s1030_s20  ;;  %p1034_p6 = scmp.lt.u32.totalorder %s1030_s20, %s1260_s10 }
 0x527   :  { %p1036_p7 = pnand %p1034_p6, %p1031_p5 }
 0x529   :  { %1039 = shalt.err (!%p1036_p7)
}
 0x52a   :  { %810 = dma.vmem_to_hbm [thread:$0]  %s808_s8, 32, %s1260_s10, [#allocation4]  }
 0x52b   :  { %1040 = dma.done.wait [#allocation4], 32  }
 0x52c   :  { %1041 = vsyncadd [#allocation4], 4294967264 }
 0x52d   :  { %814 = vsyncpa [#allocation4], 1 }

</bundles_post_ra>
